<compile_context>
chip_gen: v7x
topology: tpu7x:2x2x1
jax: 0.10.0
libtpu: 0.0.40
codegen_flags: <defaults>
</compile_context>

<pallas_src>
import jax
import jax.numpy as jnp
import numpy as np
from jax.experimental import pallas as pl
from jax.experimental.pallas import tpu as pltpu

LANE = 128


def _round_up(x, m):
    return ((x + m - 1) // m) * m


def make_layer_dims(observation_size, action_size, mean_action_size,
                    feature_size, hidden_dims):
    layer_dims = []
    for i in range(len(hidden_dims)):
        if i == 0:
            layer_dims.append([observation_size, hidden_dims[i]])
        elif i == 1:
            layer_dims.append([hidden_dims[i - 1] + mean_action_size,
                               hidden_dims[i]])
        else:
            layer_dims.append([hidden_dims[i - 1], hidden_dims[i]])
    layer_dims.append([hidden_dims[-1], action_size * feature_size])
    return layer_dims


def init_params(key, layer_dims):
    """Deterministic init matching nn.Linear's U(-1/sqrt(fan_in), 1/sqrt(fan_in)).

    Weights are stored already transposed as (in, out) so the kernel does x @ W.
    Biases are stored as (1, out) to stay 2-D for TPU layout.
    """
    params = []
    for (din, dout) in layer_dims:
        key, kw, kb = jax.random.split(key, 3)
        bound = 1.0 / np.sqrt(din)
        W = jax.random.uniform(kw, (din, dout), jnp.float32, -bound, bound)
        b = jax.random.uniform(kb, (1, dout), jnp.float32, -bound, bound)
        params.append((W, b))
    return params


def prepare_kernel_params(params, hidden_dims, mean_action_sizes):
    """Zero-pad weight/bias lane dims to multiples of 128 and split layer 1's
    weight rows according to the concat([h, *mean_action]) ordering.

    Returned order: W0, b0, W1a, W1b_0..W1b_{m-1}, b1, W2, b2, ...
    Padding is exactly zero, so all padded activation columns stay 0 through
    ReLUs and subsequent layers; the wrapper slices the padded output columns.
    """
    num_layers = len(params)
    h0 = hidden_dims[0]
    padded_hidden = [_round_up(h, LANE) for h in hidden_dims]
    out_dim = params[-1][0].shape[1]
    out_pad = _round_up(out_dim, LANE)

    def pad_cols(x, to):
        return jnp.pad(x, ((0, 0), (0, to - x.shape[1])))

    def pad_rows(x, to):
        return jnp.pad(x, ((0, to - x.shape[0]), (0, 0)))

    kparams = []

    # Layer 0: (obs_size, h0) -> (obs_size, h0_pad). Input rows stay natural.
    W0, b0 = params[0]
    kparams.append(pad_cols(W0, padded_hidden[0]))
    kparams.append(pad_cols(b0, padded_hidden[0]))

    # Layer 1: rows = [h0 | mean_action_0 | mean_action_1 | ...]
    W1, b1 = params[1]
    c1 = padded_hidden[1] if num_layers > 2 else out_pad
    kparams.append(pad_rows(pad_cols(W1[:h0, :], c1), padded_hidden[0]))  # W1a
    off = h0
    for m in mean_action_sizes:
        kparams.append(pad_cols(W1[off:off + m, :], c1))                  # W1b_j
        off += m
    kparams.append(pad_cols(b1, c1))

    # Remaining layers.
    for i in range(2, num_layers):
        W, b = params[i]
        cols = padded_hidden[i] if i < num_layers - 1 else out_pad
        kparams.append(pad_rows(pad_cols(W, cols), padded_hidden[i - 1]))
        kparams.append(pad_cols(b, cols))

    return kparams, out_pad


def make_psi_kernel(num_layers, num_mact):
    """Fused MLP kernel. Ref order:
       obs, mact_0..mact_{m-1}, W0, b0, W1a, W1b_0..W1b_{m-1}, b1,
       [W2, b2, ...], out
    """
    def kernel(*refs):
        obs_ref = refs[0]
        mact_refs = refs[1:1 + num_mact]
        out_ref = refs[-1]
        p = refs[1 + num_mact:-1]

        # Layer 0 + ReLU (lane-padded hidden width).
        h = jnp.dot(obs_ref[...], p[0][...],
                    preferred_element_type=jnp.float32) + p[1][...]
        h = jnp.maximum(h, 0.0)

        # Layer 1 on concat([h, *mean_action]) == h @ W1a + sum_j m_j @ W1b_j.
        acc = jnp.dot(h, p[2][...], preferred_element_type=jnp.float32)
        for j in range(num_mact):
            acc = acc + jnp.dot(mact_refs[j][...], p[3 + j][...],
                                preferred_element_type=jnp.float32)
        h = acc + p[3 + num_mact][...]
        if 1 < num_layers - 1:
            h = jnp.maximum(h, 0.0)

        # Remaining layers.
        idx = 4 + num_mact
        for i in range(2, num_layers):
            h = jnp.dot(h, p[idx][...],
                        preferred_element_type=jnp.float32) + p[idx + 1][...]
            idx += 2
            if i < num_layers - 1:
                h = jnp.maximum(h, 0.0)

        out_ref[...] = h.astype(out_ref.dtype)

    return kernel


def psi_forward(observation, mean_action, params, action_size, feature_size,
                hidden_dims, block_m=None):
    """observation: (N, obs_size); mean_action: list of (N, m_i) arrays."""
    num_layers = len(params)
    num_mact = len(mean_action)
    N, obs_size = observation.shape
    out_dim = action_size * feature_size
    mean_action_sizes = [int(m.shape[-1]) for m in mean_action]

    kparams, out_pad = prepare_kernel_params(params, hidden_dims,
                                             mean_action_sizes)

    # Batch tiling: rows per grid step (>=8 for sublane alignment, capped so
    # activation tiles stay small even under v7x's 64 MiB VMEM).
    if block_m is None:
        block_m = min(256, _round_up(N, 8))
    n_pad = _round_up(max(N, block_m), block_m)
    if n_pad != N:
        observation = jnp.pad(observation, ((0, n_pad - N), (0, 0)))
        mean_action = [jnp.pad(m, ((0, n_pad - N), (0, 0)))
                       for m in mean_action]
    grid = (n_pad // block_m,)

    def row_spec(d):
        # Tiled along the batch axis; full (natural or padded) lane width.
        return pl.BlockSpec((block_m, d), lambda i: (i, 0))

    def const_spec(arr):
        # Whole-array block, same block every grid step -> stays VMEM-resident.
        return pl.BlockSpec(arr.shape, lambda i: (0, 0))

    in_specs = [row_spec(obs_size)]
    in_specs += [row_spec(m.shape[-1]) for m in mean_action]
    in_specs += [const_spec(a) for a in kparams]

    out = pl.pallas_call(
        make_psi_kernel(num_layers, num_mact),
        out_shape=jax.ShapeDtypeStruct((n_pad, out_pad), jnp.float32),
        grid=grid,
        in_specs=in_specs,
        out_specs=row_spec(out_pad),
        compiler_params=pltpu.CompilerParams(
            dimension_semantics=("parallel",)),
    )(observation, *mean_action, *kparams)

    return out[:N, :out_dim].reshape(N, action_size, feature_size)


def psi_reference(observation, mean_action, params, action_size, feature_size):
    """Pure-JAX reference mirroring the PyTorch forward."""
    W0, b0 = params[0]
    x = jax.nn.relu(observation @ W0 + b0)
    x = jnp.concatenate([x] + list(mean_action), axis=-1)
    num_layers = len(params)
    for i in range(1, num_layers):
        W, b = params[i]
        x = x @ W + b
        if i < num_layers - 1:
            x = jax.nn.relu(x)
    return x.reshape(-1, action_size, feature_size)


if __name__ == "__main__":
    # Small, forward-consistent shapes.
    N = 8
    observation_size = 32
    action_size = 6
    feature_size = 8
    hidden_dims = [32, 32, 32]
    mean_action_sizes = [4, 4]            # list of mean-action blocks
    mean_action_size = sum(mean_action_sizes)

    key = jax.random.PRNGKey(0)
    key, k_obs, k_ma0, k_ma1, k_params = jax.random.split(key, 5)

    observation = jax.random.normal(k_obs, (N, observation_size), jnp.float32)
    mean_action = [
        jax.random.uniform(k_ma0, (N, mean_action_sizes[0]), jnp.float32),
        jax.random.uniform(k_ma1, (N, mean_action_sizes[1]), jnp.float32),
    ]

    layer_dims = make_layer_dims(observation_size, action_size,
                                 mean_action_size, feature_size, hidden_dims)
    params = init_params(k_params, layer_dims)

    out = psi_forward(observation, mean_action, params, action_size,
                      feature_size, hidden_dims)
    out = jax.block_until_ready(out)

    ref = psi_reference(observation, mean_action, params, action_size,
                        feature_size)
    assert out.shape == (N, action_size, feature_size), out.shape
    np.testing.assert_allclose(np.asarray(out), np.asarray(ref),
                               rtol=1e-5, atol=1e-5)
    print("KERNEL_OK")
</pallas_src>

<mosaic_0001>
module attributes {stable_mosaic.version = 11 : i64} {
  func.func @kernel(%arg0: i32, %arg1: memref<8x32xf32, #tpu.memory_space<vmem>>, %arg2: memref<8x4xf32, #tpu.memory_space<vmem>>, %arg3: memref<8x4xf32, #tpu.memory_space<vmem>>, %arg4: memref<32x128xf32, #tpu.memory_space<vmem>>, %arg5: memref<1x128xf32, #tpu.memory_space<vmem>>, %arg6: memref<128x128xf32, #tpu.memory_space<vmem>>, %arg7: memref<4x128xf32, #tpu.memory_space<vmem>>, %arg8: memref<4x128xf32, #tpu.memory_space<vmem>>, %arg9: memref<1x128xf32, #tpu.memory_space<vmem>>, %arg10: memref<128x128xf32, #tpu.memory_space<vmem>>, %arg11: memref<1x128xf32, #tpu.memory_space<vmem>>, %arg12: memref<128x128xf32, #tpu.memory_space<vmem>>, %arg13: memref<1x128xf32, #tpu.memory_space<vmem>>, %arg14: memref<8x128xf32, #tpu.memory_space<vmem>>) attributes {dimension_semantics = [#tpu.dimension_semantics<parallel>], iteration_bounds = array<i64: 1>, scalar_prefetch = 0 : i64, scratch_operands = 0 : i64, tpu.core_type = #tpu.core_type<tc>, window_params = [{transform_indices = @transform_0, window_bounds = array<i64: 8, 32>}, {transform_indices = @transform_1, window_bounds = array<i64: 8, 4>}, {transform_indices = @transform_2, window_bounds = array<i64: 8, 4>}, {pipeline_mode = #tpu.pipeline_mode<synchronous>, transform_indices = @transform_3, window_bounds = array<i64: 32, 128>}, {pipeline_mode = #tpu.pipeline_mode<synchronous>, transform_indices = @transform_4, window_bounds = array<i64: 1, 128>}, {pipeline_mode = #tpu.pipeline_mode<synchronous>, transform_indices = @transform_5, window_bounds = array<i64: 128, 128>}, {pipeline_mode = #tpu.pipeline_mode<synchronous>, transform_indices = @transform_6, window_bounds = array<i64: 4, 128>}, {pipeline_mode = #tpu.pipeline_mode<synchronous>, transform_indices = @transform_7, window_bounds = array<i64: 4, 128>}, {pipeline_mode = #tpu.pipeline_mode<synchronous>, transform_indices = @transform_8, window_bounds = array<i64: 1, 128>}, {pipeline_mode = #tpu.pipeline_mode<synchronous>, transform_indices = @transform_9, window_bounds = array<i64: 128, 128>}, {pipeline_mode = #tpu.pipeline_mode<synchronous>, transform_indices = @transform_10, window_bounds = array<i64: 1, 128>}, {pipeline_mode = #tpu.pipeline_mode<synchronous>, transform_indices = @transform_11, window_bounds = array<i64: 128, 128>}, {pipeline_mode = #tpu.pipeline_mode<synchronous>, transform_indices = @transform_12, window_bounds = array<i64: 1, 128>}, {transform_indices = @transform_13, window_bounds = array<i64: 8, 128>}]} {
    %c0 = arith.constant 0 : index
    %c0_0 = arith.constant 0 : index
    %0 = vector.load %arg1[%c0, %c0_0] : memref<8x32xf32, #tpu.memory_space<vmem>>, vector<8x32xf32>
    %c0_1 = arith.constant 0 : index
    %c0_2 = arith.constant 0 : index
    %1 = vector.load %arg4[%c0_1, %c0_2] : memref<32x128xf32, #tpu.memory_space<vmem>>, vector<32x128xf32>
    %cst = arith.constant dense<0.000000e+00> : vector<8x128xf32>
    %2 = tpu.matmul %0, %1, %cst {dimension_numbers = #tpu.dot_dimension_numbers<[1], [0], [0], [1], [0, 0, 1, 1], [], []>} : vector<8x32xf32>, vector<32x128xf32>, vector<8x128xf32> -> vector<8x128xf32>
    %c0_3 = arith.constant 0 : index
    %c0_4 = arith.constant 0 : index
    %3 = vector.load %arg5[%c0_3, %c0_4] : memref<1x128xf32, #tpu.memory_space<vmem>>, vector<1x128xf32>
    %4 = vector.broadcast %3 : vector<1x128xf32> to vector<8x128xf32>
    %5 = arith.addf %2, %4 : vector<8x128xf32>
    %cst_5 = arith.constant 0.000000e+00 : f32
    %6 = vector.broadcast %cst_5 : f32 to vector<8x128xf32>
    %7 = arith.maximumf %5, %6 : vector<8x128xf32>
    %c0_6 = arith.constant 0 : index
    %c0_7 = arith.constant 0 : index
    %8 = vector.load %arg6[%c0_6, %c0_7] : memref<128x128xf32, #tpu.memory_space<vmem>>, vector<128x128xf32>
    %cst_8 = arith.constant dense<0.000000e+00> : vector<8x128xf32>
    %9 = tpu.matmul %7, %8, %cst_8 {dimension_numbers = #tpu.dot_dimension_numbers<[1], [0], [0], [1], [0, 0, 1, 1], [], []>} : vector<8x128xf32>, vector<128x128xf32>, vector<8x128xf32> -> vector<8x128xf32>
    %c0_9 = arith.constant 0 : index
    %c0_10 = arith.constant 0 : index
    %10 = vector.load %arg2[%c0_9, %c0_10] : memref<8x4xf32, #tpu.memory_space<vmem>>, vector<8x4xf32>
    %c0_11 = arith.constant 0 : index
    %c0_12 = arith.constant 0 : index
    %11 = vector.load %arg7[%c0_11, %c0_12] : memref<4x128xf32, #tpu.memory_space<vmem>>, vector<4x128xf32>
    %cst_13 = arith.constant dense<0.000000e+00> : vector<8x128xf32>
    %12 = tpu.matmul %10, %11, %cst_13 {dimension_numbers = #tpu.dot_dimension_numbers<[1], [0], [0], [1], [0, 0, 1, 1], [], []>} : vector<8x4xf32>, vector<4x128xf32>, vector<8x128xf32> -> vector<8x128xf32>
    %13 = arith.addf %9, %12 : vector<8x128xf32>
    %c0_14 = arith.constant 0 : index
    %c0_15 = arith.constant 0 : index
    %14 = vector.load %arg3[%c0_14, %c0_15] : memref<8x4xf32, #tpu.memory_space<vmem>>, vector<8x4xf32>
    %c0_16 = arith.constant 0 : index
    %c0_17 = arith.constant 0 : index
    %15 = vector.load %arg8[%c0_16, %c0_17] : memref<4x128xf32, #tpu.memory_space<vmem>>, vector<4x128xf32>
    %cst_18 = arith.constant dense<0.000000e+00> : vector<8x128xf32>
    %16 = tpu.matmul %14, %15, %cst_18 {dimension_numbers = #tpu.dot_dimension_numbers<[1], [0], [0], [1], [0, 0, 1, 1], [], []>} : vector<8x4xf32>, vector<4x128xf32>, vector<8x128xf32> -> vector<8x128xf32>
    %17 = arith.addf %13, %16 : vector<8x128xf32>
    %c0_19 = arith.constant 0 : index
    %c0_20 = arith.constant 0 : index
    %18 = vector.load %arg9[%c0_19, %c0_20] : memref<1x128xf32, #tpu.memory_space<vmem>>, vector<1x128xf32>
    %19 = vector.broadcast %18 : vector<1x128xf32> to vector<8x128xf32>
    %20 = arith.addf %17, %19 : vector<8x128xf32>
    %cst_21 = arith.constant 0.000000e+00 : f32
    %21 = vector.broadcast %cst_21 : f32 to vector<8x128xf32>
    %22 = arith.maximumf %20, %21 : vector<8x128xf32>
    %c0_22 = arith.constant 0 : index
    %c0_23 = arith.constant 0 : index
    %23 = vector.load %arg10[%c0_22, %c0_23] : memref<128x128xf32, #tpu.memory_space<vmem>>, vector<128x128xf32>
    %cst_24 = arith.constant dense<0.000000e+00> : vector<8x128xf32>
    %24 = tpu.matmul %22, %23, %cst_24 {dimension_numbers = #tpu.dot_dimension_numbers<[1], [0], [0], [1], [0, 0, 1, 1], [], []>} : vector<8x128xf32>, vector<128x128xf32>, vector<8x128xf32> -> vector<8x128xf32>
    %c0_25 = arith.constant 0 : index
    %c0_26 = arith.constant 0 : index
    %25 = vector.load %arg11[%c0_25, %c0_26] : memref<1x128xf32, #tpu.memory_space<vmem>>, vector<1x128xf32>
    %26 = vector.broadcast %25 : vector<1x128xf32> to vector<8x128xf32>
    %27 = arith.addf %24, %26 : vector<8x128xf32>
    %cst_27 = arith.constant 0.000000e+00 : f32
    %28 = vector.broadcast %cst_27 : f32 to vector<8x128xf32>
    %29 = arith.maximumf %27, %28 : vector<8x128xf32>
    %c0_28 = arith.constant 0 : index
    %c0_29 = arith.constant 0 : index
    %30 = vector.load %arg12[%c0_28, %c0_29] : memref<128x128xf32, #tpu.memory_space<vmem>>, vector<128x128xf32>
    %cst_30 = arith.constant dense<0.000000e+00> : vector<8x128xf32>
    %31 = tpu.matmul %29, %30, %cst_30 {dimension_numbers = #tpu.dot_dimension_numbers<[1], [0], [0], [1], [0, 0, 1, 1], [], []>} : vector<8x128xf32>, vector<128x128xf32>, vector<8x128xf32> -> vector<8x128xf32>
    %c0_31 = arith.constant 0 : index
    %c0_32 = arith.constant 0 : index
    %32 = vector.load %arg13[%c0_31, %c0_32] : memref<1x128xf32, #tpu.memory_space<vmem>>, vector<1x128xf32>
    %33 = vector.broadcast %32 : vector<1x128xf32> to vector<8x128xf32>
    %34 = arith.addf %31, %33 : vector<8x128xf32>
    %c0_33 = arith.constant 0 : index
    %c0_34 = arith.constant 0 : index
    %35 = vector.load %arg14[%c0_33, %c0_34] : memref<8x128xf32, #tpu.memory_space<vmem>>, vector<8x128xf32>
    tpu.vector_store %arg14[%c0_33, %c0_34], %34 {strides = array<i32>} : memref<8x128xf32, #tpu.memory_space<vmem>>, vector<8x128xf32>,
    return
  }
  func.func @transform_0(%arg0: i32) -> (i32, i32) {
    %c0_i32 = arith.constant 0 : i32
    %c0_i32_0 = arith.constant 0 : i32
    return %arg0, %c0_i32 : i32, i32
  }
  func.func @transform_1(%arg0: i32) -> (i32, i32) {
    %c0_i32 = arith.constant 0 : i32
    %c0_i32_0 = arith.constant 0 : i32
    return %arg0, %c0_i32 : i32, i32
  }
  func.func @transform_2(%arg0: i32) -> (i32, i32) {
    %c0_i32 = arith.constant 0 : i32
    %c0_i32_0 = arith.constant 0 : i32
    return %arg0, %c0_i32 : i32, i32
  }
  func.func @transform_3(%arg0: i32) -> (i32, i32) {
    %c0_i32 = arith.constant 0 : i32
    %c0_i32_0 = arith.constant 0 : i32
    %c0_i32_1 = arith.constant 0 : i32
    return %c0_i32, %c0_i32_0 : i32, i32
  }
  func.func @transform_4(%arg0: i32) -> (i32, i32) {
    %c0_i32 = arith.constant 0 : i32
    %c0_i32_0 = arith.constant 0 : i32
    %c0_i32_1 = arith.constant 0 : i32
    return %c0_i32, %c0_i32_0 : i32, i32
  }
  func.func @transform_5(%arg0: i32) -> (i32, i32) {
    %c0_i32 = arith.constant 0 : i32
    %c0_i32_0 = arith.constant 0 : i32
    %c0_i32_1 = arith.constant 0 : i32
    return %c0_i32, %c0_i32_0 : i32, i32
  }
  func.func @transform_6(%arg0: i32) -> (i32, i32) {
    %c0_i32 = arith.constant 0 : i32
    %c0_i32_0 = arith.constant 0 : i32
    %c0_i32_1 = arith.constant 0 : i32
    return %c0_i32, %c0_i32_0 : i32, i32
  }
  func.func @transform_7(%arg0: i32) -> (i32, i32) {
    %c0_i32 = arith.constant 0 : i32
    %c0_i32_0 = arith.constant 0 : i32
    %c0_i32_1 = arith.constant 0 : i32
    return %c0_i32, %c0_i32_0 : i32, i32
  }
  func.func @transform_8(%arg0: i32) -> (i32, i32) {
    %c0_i32 = arith.constant 0 : i32
    %c0_i32_0 = arith.constant 0 : i32
    %c0_i32_1 = arith.constant 0 : i32
    return %c0_i32, %c0_i32_0 : i32, i32
  }
  func.func @transform_9(%arg0: i32) -> (i32, i32) {
    %c0_i32 = arith.constant 0 : i32
    %c0_i32_0 = arith.constant 0 : i32
    %c0_i32_1 = arith.constant 0 : i32
    return %c0_i32, %c0_i32_0 : i32, i32
  }
  func.func @transform_10(%arg0: i32) -> (i32, i32) {
    %c0_i32 = arith.constant 0 : i32
    %c0_i32_0 = arith.constant 0 : i32
    %c0_i32_1 = arith.constant 0 : i32
    return %c0_i32, %c0_i32_0 : i32, i32
  }
  func.func @transform_11(%arg0: i32) -> (i32, i32) {
    %c0_i32 = arith.constant 0 : i32
    %c0_i32_0 = arith.constant 0 : i32
    %c0_i32_1 = arith.constant 0 : i32
    return %c0_i32, %c0_i32_0 : i32, i32
  }
  func.func @transform_12(%arg0: i32) -> (i32, i32) {
    %c0_i32 = arith.constant 0 : i32
    %c0_i32_0 = arith.constant 0 : i32
    %c0_i32_1 = arith.constant 0 : i32
    return %c0_i32, %c0_i32_0 : i32, i32
  }
  func.func @transform_13(%arg0: i32) -> (i32, i32) {
    %c0_i32 = arith.constant 0 : i32
    %c0_i32_0 = arith.constant 0 : i32
    return %arg0, %c0_i32 : i32, i32
  }
}

</mosaic_0001>

<bundles_post_ra>
// kernel: tpu_custom_call.1
= control target key start
LH: loop header
LB: loop body
LE: loop exit
PB: predicated region body
PF: predicated region fallthrough
CT: control target
= control target key end

     0   :  { %18 = vsyncpa [#allocation3], 0  ;;  %s1272_s0 = inlined_call_operand.hbm [shape: f32[8,32], index: 0, kind: input, shape index: {}]   ;;  %s1273_s1 = inlined_call_operand.vmem [shape: f32[8,4], index: 1, kind: input, shape index: {}]   ;;  %s1274_s2 = inlined_call_operand.vmem [shape: f32[8,4], index: 2, kind: input, shape index: {}]   ;;  %s1275_s3 = inlined_call_operand.vmem [shape: f32[32,128], index: 3, kind: input, shape index: {}]   ;;  %s1276_s4 = inlined_call_operand.vmem [shape: f32[1,128], index: 4, kind: input, shape index: {}]   ;;  %s1277_s5 = inlined_call_operand.hbm [shape: f32[128,128], index: 5, kind: input, shape index: {}]   ;;  %s1278_s6 = inlined_call_operand.vmem [shape: f32[4,128], index: 6, kind: input, shape index: {}]   ;;  %s1279_s7 = inlined_call_operand.vmem [shape: f32[4,128], index: 7, kind: input, shape index: {}]   ;;  %s1280_s8 = inlined_call_operand.vmem [shape: f32[1,128], index: 8, kind: input, shape index: {}]   ;;  %s1281_s9 = inlined_call_operand.hbm [shape: f32[128,128], index: 9, kind: input, shape index: {}]   ;;  %s1282_s10 = inlined_call_operand.vmem [shape: f32[1,128], index: 10, kind: input, shape index: {}]   ;;  %s1283_s11 = inlined_call_operand.hbm [shape: f32[128,128], index: 11, kind: input, shape index: {}]   ;;  %s1284_s12 = inlined_call_operand.vmem [shape: f32[1,128], index: 12, kind: input, shape index: {}]   ;;  %s1285_s13 = inlined_call_operand.hbm [shape: f32[8,128], index: 13, kind: output, shape index: {}]  }
   0x1   :  { %19 = vsyncpa [#allocation6], 0 }
   0x2   :  { %20 = vsyncpa [#allocation9], 0 }
   0x3   :  { %21 = vsyncpa [#allocation4], 0  ;;  %s1045_s25 = smov [#allocation5]   ;;  %s927_s29 = scalar_lea.hbm %s1277_s5, 2048 }
   0x4   :  { %s45_s26 = sshll.u32 %s1045_s25, 4  ;;  %p928_p0 = scmp.ne.s32.totalorder %s1277_s5, %s927_s29  ;;  %s46_s26 = int_to_ptr.vmem [resolvable:$true] %s45_s26 }
   0x5   :  { %p931_p1 = scmp.lt.u32.totalorder %s927_s29, %s1277_s5 }
   0x7   :  { %p933_p2 = pnand %p931_p1, %p928_p0 }
   0x9   :  { %936 = shalt.err (!%p933_p2)
}
   0xa   :  { %s937_s17 = scalar_lea.vmem %s46_s26, 2048  ;;  %p942_p4 = scmp.lt.s32.totalorder %s46_s26, %s46_s26 }
   0xb   :  { %p938_p3 = scmp.ne.s32.totalorder %s46_s26, %s937_s17  ;;  %p943_p5 = scmp.lt.s32.totalorder %s937_s17, %s937_s17 }
   0xd   :  { %p944_p6 = por %p943_p5, %p942_p4 }
   0xf   :  { %p945_p7 = pnand %p944_p6, %p938_p3 }
  0x11   :  { %948 = shalt.err (!%p945_p7)
}
  0x12   :  { %s1046_s18 = smov 128   ;;  %s1047_s19 = smov 8  }
  0x13   :  { %51 = dma.hbm_to_vmem [thread:$0]  %s1277_s5, 2048, %s46_s26, [#allocation6], %s1046_s18, %s1046_s18, %s1047_s19  }
  0x14   :  { %s1048_s22 = smov [#allocation2]   ;;  %s1049_s24 = smov [#allocation7]  }
  0x15   :  { %s28_s23 = sshll.u32 %s1048_s22, 4  ;;  %s63_s25 = sshll.u32 %s1049_s24, 4  ;;  %s29_s23 = int_to_ptr.vmem [resolvable:$true] %s28_s23  ;;  %s64_s25 = int_to_ptr.vmem [resolvable:$true] %s63_s25 }
  0x16   :  { %s949_s29 = scalar_lea.hbm %s1272_s0, 128 }
  0x17   :  { %p950_p8 = scmp.ne.s32.totalorder %s1272_s0, %s949_s29  ;;  %p953_p9 = scmp.lt.u32.totalorder %s949_s29, %s1272_s0 }
  0x19   :  { %p955_p10 = pnand %p953_p9, %p950_p8 }
  0x1b   :  { %958 = shalt.err (!%p955_p10)
}
  0x1c   :  { %s959_s5 = scalar_lea.vmem %s29_s23, 128  ;;  %p964_p12 = scmp.lt.s32.totalorder %s29_s23, %s29_s23 }
  0x1d   :  { %p960_p11 = scmp.ne.s32.totalorder %s29_s23, %s959_s5  ;;  %p965_p13 = scmp.lt.s32.totalorder %s959_s5, %s959_s5 }
  0x1f   :  { %p966_p0 = por %p965_p13, %p964_p12 }
  0x21   :  { %p967_p1 = pnand %p966_p0, %p960_p11 }
  0x23   :  { %970 = shalt.err (!%p967_p1)
}
  0x24   :  { %31 = dma.hbm_to_vmem [thread:$0]  %s1272_s0, 128, %s29_s23, [#allocation3]  }
  0x25   :  { %s971_s22 = scalar_lea.hbm %s1281_s9, 2048 }
  0x26   :  { %p972_p2 = scmp.ne.s32.totalorder %s1281_s9, %s971_s22  ;;  %p975_p3 = scmp.lt.u32.totalorder %s971_s22, %s1281_s9 }
  0x28   :  { %p977_p4 = pnand %p975_p3, %p972_p2 }
  0x2a   :  { %980 = shalt.err (!%p977_p4)
}
  0x2b   :  { %s981_s30 = scalar_lea.vmem %s64_s25, 2048  ;;  %p986_p6 = scmp.lt.s32.totalorder %s64_s25, %s64_s25 }
  0x2c   :  { %p982_p5 = scmp.ne.s32.totalorder %s64_s25, %s981_s30  ;;  %p987_p7 = scmp.lt.s32.totalorder %s981_s30, %s981_s30 }
  0x2e   :  { %p988_p8 = por %p987_p7, %p986_p6 }
  0x30   :  { %p989_p9 = pnand %p988_p8, %p982_p5 }
  0x32   :  { %992 = shalt.err (!%p989_p9)
}
  0x33   :  { %69 = dma.hbm_to_vmem [thread:$0]  %s1281_s9, 2048, %s64_s25, [#allocation6], %s1046_s18, %s1046_s18, %s1047_s19  }
  0x34   :  { %s1050_s14 = smov [#allocation8]   ;;  %s993_s26 = scalar_lea.hbm %s1283_s11, 2048 }
  0x35   :  { %s77_s15 = sshll.u32 %s1050_s14, 4  ;;  %p994_p10 = scmp.ne.s32.totalorder %s1283_s11, %s993_s26  ;;  %s78_s15 = int_to_ptr.vmem [resolvable:$true] %s77_s15 }
  0x36   :  { %p997_p11 = scmp.lt.u32.totalorder %s993_s26, %s1283_s11 }
  0x38   :  { %p999_p12 = pnand %p997_p11, %p994_p10 }
  0x3a   :  { %1002 = shalt.err (!%p999_p12)
}
  0x3b   :  { %s1003_s24 = scalar_lea.vmem %s78_s15, 2048  ;;  %p1008_p0 = scmp.lt.s32.totalorder %s78_s15, %s78_s15 }
  0x3c   :  { %p1004_p13 = scmp.ne.s32.totalorder %s78_s15, %s1003_s24  ;;  %p1009_p1 = scmp.lt.s32.totalorder %s1003_s24, %s1003_s24 }
  0x3e   :  { %p1010_p2 = por %p1009_p1, %p1008_p0 }
  0x40   :  { %p1011_p3 = pnand %p1010_p2, %p1004_p13 }
  0x42   :  { %1014 = shalt.err (!%p1011_p3)
}
  0x43   :  { %83 = dma.hbm_to_vmem [thread:$0]  %s1283_s11, 2048, %s78_s15, [#allocation9], %s1046_s18, %s1046_s18, %s1047_s19  }
  0x44   :  { %1037 = dma.done.wait [#allocation3], 128  }
  0x45   :  { %1038 = vsyncadd [#allocation3], 4294967168 }
  0x46   :  { %1039 = dma.done.wait [#allocation6], 4096  }
  0x47   :  { %1040 = vsyncadd [#allocation6], 4294963200 }
  0x48   :  { %1041 = dma.done.wait [#allocation9], 2048  }
  0x49   :  { %1042 = vsyncadd [#allocation9], 4294965248  ;;  %v1051_v0 = vmov 0.0|0.0   ;;  %vm1052_vm0 = vmmov 0   ;;  %v1053_v1 = vmov 0.0   ;;  %v99_v2 = vld [vmem:[%s1275_s3] sm:$0xff] }
  0x4a   :  { %839 = vmatprep.subr.bf16.mxu0 %v1051_v0  ;;  %721 = vmatprep.mubr.msk.f32.mxu0 %vm1052_vm0, %v1053_v1  ;;  %v100_v3 = vld [vmem:[%s1275_s3 + $0x8] sm:$0xff]  ;;  %v101_v4 = vld [vmem:[%s1275_s3 + $0x10] sm:$0xff]  ;;  %v102_v6 = vld [vmem:[%s1275_s3 + $0x18] sm:$0xff]  ;;  %vm110_vm1 = vcmask 261120   ;;  %vm207_vm2 = vcmask 1043456   ;;  %vm203_vm3 = vcmask 31744  }
  0x4b   :  { %845 = vmatprep.subr.bf16.mxu1 %v1051_v0  ;;  %761 = vmatprep.mubr.msk.f32.mxu1 %vm1052_vm0, %v1053_v1  ;;  %v840_v5 = vpack.c.bf16 %v100_v3, %v99_v2  ;;  %v185_v7 = vld [vmem:[#allocation5] sm:$0xff]  ;;  %v186_v8 = vld [vmem:[#allocation5 + $0x8] sm:$0xff]  ;;  %v187_v9 = vld [vmem:[#allocation5 + $0x10] sm:$0xff]  ;;  %v843_v11 = vpack.c.bf16 %v102_v6, %v101_v4 }
  0x4c   :  { %v188_v10 = vld [vmem:[#allocation5 + $0x18] sm:$0xff]  ;;  %v846_v12 = vpack.c.bf16 %v186_v8, %v185_v7  ;;  %v189_v14 = vld [vmem:[#allocation5 + $0x20] sm:$0xff]  ;;  %v190_v15 = vld [vmem:[#allocation5 + $0x28] sm:$0xff] }
  0x4d   :  { %841 = vmatpush3.bf16.msra.mxu0 %v840_v5  ;;  %v849_v13 = vpack.c.bf16 %v188_v10, %v187_v9  ;;  %v98_v16 = vld [vmem:[#allocation2] sm:$0xff]  ;;  %v852_v18 = vpack.c.bf16 %v190_v15, %v189_v14  ;;  %v191_v19 = vld [vmem:[#allocation5 + $0x30] sm:$0xff]  ;;  %v193_v22 = vld [vmem:[#allocation5 + $0x40] sm:$0xff] }
  0x4e   :  { %842 = vmatprep.subr.bf16.mxu0 %v1051_v0  ;;  %847 = vmatpush3.bf16.msra.mxu1 %v846_v12  ;;  %v202_v17 = vld [vmem:[%s1278_s6] sm:$0xf]  ;;  %v194_v23 = vld [vmem:[#allocation5 + $0x48] sm:$0xff]  ;;  %v195_v25 = vld [vmem:[#allocation5 + $0x50] sm:$0xff] }
  0x4f   :  { %848 = vmatprep.subr.bf16.mxu1 %v1051_v0  ;;  %v192_v20 = vld [vmem:[#allocation5 + $0x38] sm:$0xff]  ;;  %v858_v24 = vpack.c.bf16 %v194_v23, %v193_v22  ;;  %v197_v28 = vld [vmem:[#allocation5 + $0x60] sm:$0xff]  ;;  %v198_v29 = vld [vmem:[#allocation5 + $0x68] sm:$0xff] }
  0x50   :  { %v855_v21 = vpack.c.bf16 %v192_v20, %v191_v19  ;;  %v196_v26 = vld [vmem:[#allocation5 + $0x58] sm:$0xff]  ;;  %v864_v30 = vpack.c.bf16 %v198_v29, %v197_v28  ;;  %v199_v31 = vld [vmem:[#allocation5 + $0x70] sm:$0xff]  ;;  %v439_v37 = vld [vmem:[#allocation7] sm:$0xff] }
  0x51   :  { %844 = vmatpush3.bf16.msra.mxu0 %v843_v11  ;;  %v861_v27 = vpack.c.bf16 %v196_v26, %v195_v25  ;;  %v200_v32 = vld [vmem:[#allocation5 + $0x78] sm:$0xff]  ;;  %v440_v38 = vld [vmem:[#allocation7 + $0x8] sm:$0xff]  ;;  %v441_v40 = vld [vmem:[#allocation7 + $0x10] sm:$0xff] }
  0x52   :  { %724 = vmatprep.subr.mxu0 %v1053_v1  ;;  %850 = vmatpush3.bf16.msra.mxu1 %v849_v13  ;;  %v867_v33 = vpack.c.bf16 %v200_v32, %v199_v31  ;;  %v201_v34 = vld [vmem:[%s1273_s1] sm:$0xff]  ;;  %v870_v39 = vpack.c.bf16 %v440_v38, %v439_v37  ;;  %v443_v43 = vld [vmem:[#allocation7 + $0x20] sm:$0xff]  ;;  %v444_v44 = vld [vmem:[#allocation7 + $0x28] sm:$0xff] }
  0x53   :  { %851 = vmatprep.subr.bf16.mxu1 %v1051_v0  ;;  %v352_v35 = vld [vmem:[%s1279_s7] sm:$0xf]  ;;  %v876_v45 = vpack.c.bf16 %v444_v44, %v443_v43  ;;  %v445_v46 = vld [vmem:[#allocation7 + $0x30] sm:$0xff]  ;;  %v447_v49 = vld [vmem:[#allocation7 + $0x40] sm:$0xff] }
  0x54   :  { %722 = vmatmul.mubr.msk.f32.vlgmr.msra.gmra.mrb[0].mxu0 %vm110_vm1, %v98_v16  ;;  %v351_v36 = vld [vmem:[%s1274_s2] sm:$0xff]  ;;  %v448_v50 = vld [vmem:[#allocation7 + $0x48] sm:$0xff]  ;;  %v449_v52 = vld [vmem:[#allocation7 + $0x50] sm:$0xff] }
  0x55   :  { %725 = vmatpush3.msk.msra.mxu0 %vm207_vm2, %v202_v17  ;;  %726 = vmatprep.mubr.msk.f32.mxu0 %vm1052_vm0, %v1053_v1  ;;  %v442_v41 = vld [vmem:[#allocation7 + $0x18] sm:$0xff]  ;;  %v882_v51 = vpack.c.bf16 %v448_v50, %v447_v49  ;;  %v451_v62 = vld [vmem:[#allocation7 + $0x60] sm:$0xff]  ;;  %v452_v63 = vld [vmem:[#allocation7 + $0x68] sm:$0xff] }
  0x56   :  { %764 = vmatprep.subr.mxu0 %v1053_v1  ;;  %853 = vmatpush3.bf16.msra.mxu1 %v852_v18  ;;  %v873_v42 = vpack.c.bf16 %v442_v41, %v441_v40  ;;  %v446_v47 = vld [vmem:[#allocation7 + $0x38] sm:$0xff]  ;;  %v888_v2 = vpack.c.bf16 %v452_v63, %v451_v62  ;;  %v453_v5 = vld [vmem:[#allocation7 + $0x70] sm:$0xff]  ;;  %v533_v8 = vld [vmem:[#allocation8] sm:$0xff] }
  0x57   :  { %854 = vmatprep.subr.bf16.mxu1 %v1051_v0  ;;  %v879_v48 = vpack.c.bf16 %v446_v47, %v445_v46  ;;  %v450_v53 = vld [vmem:[#allocation7 + $0x58] sm:$0xff]  ;;  %v534_v9 = vld [vmem:[#allocation8 + $0x8] sm:$0xff]  ;;  %v535_v10 = vld [vmem:[#allocation8 + $0x10] sm:$0xff] }
  0x58   :  { %727 = vmatmul.mubr.msk.f32.vlgmr.msra.gmra.mrb[2].mxu0 %vm203_vm3, %v201_v34  ;;  %v885_v54 = vpack.c.bf16 %v450_v53, %v449_v52  ;;  %v644_v55 = vld [vmem:[%s1276_s4] ss:$0 sm:$0xff]  ;;  %v894_v11 = vpack.c.bf16 %v534_v9, %v533_v8  ;;  %v537_v13 = vld [vmem:[#allocation8 + $0x20] sm:$0xff]  ;;  %v538_v14 = vld [vmem:[#allocation8 + $0x28] sm:$0xff] }
  0x59   :  { %766 = vmatprep.mubr.msk.f32.mxu0 %vm1052_vm0, %v1053_v1  ;;  %765 = vmatpush3.msk.msra.mxu0 %vm207_vm2, %v352_v35  ;;  %v454_v6 = vld [vmem:[#allocation7 + $0x78] sm:$0xff]  ;;  %v900_v15 = vpack.c.bf16 %v538_v14, %v537_v13  ;;  %v539_v16 = vld [vmem:[#allocation8 + $0x30] sm:$0xff]  ;;  %v541_v19 = vld [vmem:[#allocation8 + $0x40] sm:$0xff] }
  0x5a   :  { %856 = vmatpush3.bf16.msra.mxu1 %v855_v21  ;;  %869 = vmatprep.subr.bf16.mxu0 %v1051_v0  ;;  %v891_v7 = vpack.c.bf16 %v454_v6, %v453_v5  ;;  %v536_v12 = vld [vmem:[#allocation8 + $0x18] sm:$0xff]  ;;  %v542_v20 = vld [vmem:[#allocation8 + $0x48] sm:$0xff]  ;;  %v543_v22 = vld [vmem:[#allocation8 + $0x50] sm:$0xff] }
  0x5b   :  { %857 = vmatprep.subr.bf16.mxu1 %v1051_v0  ;;  %v540_v17 = vld [vmem:[#allocation8 + $0x38] sm:$0xff]  ;;  %v906_v21 = vpack.c.bf16 %v542_v20, %v541_v19  ;;  %v545_v25 = vld [vmem:[#allocation8 + $0x60] sm:$0xff]  ;;  %v546_v26 = vld [vmem:[#allocation8 + $0x68] sm:$0xff] }
  0x5c   :  { %767 = vmatmul.mubr.msk.f32.vlgmr.msra.gmra.mrb[4].mxu0 %vm203_vm3, %v351_v36  ;;  %v903_v18 = vpack.c.bf16 %v540_v17, %v539_v16  ;;  %v544_v23 = vld [vmem:[#allocation8 + $0x58] sm:$0xff]  ;;  %v547_v35 = vld [vmem:[#allocation8 + $0x70] sm:$0xff] }
  0x5d   :  { %801 = vmatprep.mubr.msk.f32.mxu0 %vm1052_vm0, %v1053_v1  ;;  %871 = vmatpush3.bf16.msra.mxu0 %v870_v39  ;;  %v650_v31 = vld [vmem:[%s1280_s8] ss:$0 sm:$0xff]  ;;  %s1054_s8 = smov [#allocation10]  }
  0x5e   :  { %859 = vmatpush3.bf16.msra.mxu1 %v858_v24  ;;  %872 = vmatprep.subr.bf16.mxu0 %v1051_v0  ;;  %v909_v24 = vpack.c.bf16 %v544_v23, %v543_v22  ;;  %v548_v36 = vld [vmem:[#allocation8 + $0x78] sm:$0xff]  ;;  %s633_s24 = sshll.u32 %s1054_s8, 4  ;;  %s634_s24 = int_to_ptr.vmem [resolvable:$true] %s633_s24 }
  0x5f   :  { %860 = vmatprep.subr.bf16.mxu1 %v1051_v0  ;;  %v915_v37 = vpack.c.bf16 %v548_v36, %v547_v35  ;;  %v651_v38 = vld [vmem:[%s1282_s10] ss:$0 sm:$0xff]  ;;  %s1015_s9 = scalar_lea.vmem %s634_s24, 128  ;;  %p1020_p5 = scmp.lt.s32.totalorder %s634_s24, %s634_s24 }
  0x60   :  { %p1016_p4 = scmp.ne.s32.totalorder %s634_s24, %s1015_s9  ;;  %p1021_p6 = scmp.lt.s32.totalorder %s1015_s9, %s1015_s9 }
  0x61   :  { %874 = vmatpush3.bf16.msra.mxu0 %v873_v42  ;;  %v652_v42 = vld [vmem:[%s1284_s12] ss:$0 sm:$0xff] }
  0x62   :  { %862 = vmatpush3.bf16.msra.mxu1 %v861_v27  ;;  %875 = vmatprep.subr.bf16.mxu0 %v1051_v0  ;;  %v912_v27 = vpack.c.bf16 %v546_v26, %v545_v25  ;;  %p1022_p7 = por %p1021_p6, %p1020_p5 }
  0x63   :  { %863 = vmatprep.subr.bf16.mxu1 %v1051_v0 }
  0x64   :  { %p1023_p8 = pnand %p1022_p7, %p1016_p4 }
  0x65   :  { %877 = vmatpush3.bf16.msra.mxu0 %v876_v45 }
  0x66   :  { %865 = vmatpush3.bf16.msra.mxu1 %v864_v30  ;;  %878 = vmatprep.subr.bf16.mxu0 %v1051_v0 }
  0x67   :  { %866 = vmatprep.subr.bf16.mxu1 %v1051_v0 }
  0x69   :  { %880 = vmatpush3.bf16.msra.mxu0 %v879_v48 }
  0x6a   :  { %868 = vmatpush3.bf16.msra.mxu1 %v867_v33  ;;  %881 = vmatprep.subr.bf16.mxu0 %v1051_v0 }
  0x6b   :  { %893 = vmatprep.subr.bf16.mxu1 %v1051_v0 }
  0x6d   :  { %883 = vmatpush3.bf16.msra.mxu0 %v882_v51 }
  0x6e   :  { %884 = vmatprep.subr.bf16.mxu0 %v1051_v0 }
  0x71   :  { %886 = vmatpush3.bf16.msra.mxu0 %v885_v54 }
  0x72   :  { %887 = vmatprep.subr.bf16.mxu0 %v1051_v0 }
  0x75   :  { %889 = vmatpush3.bf16.msra.mxu0 %v888_v2 }
  0x76   :  { %890 = vmatprep.subr.bf16.mxu0 %v1051_v0 }
  0x79   :  { %892 = vmatpush3.bf16.msra.mxu0 %v891_v7 }
 0x127   :  { %v180_v56 = vpop.f32.mrb[0].mxu0 }
 0x128   :  { %v181_v57 = vadd.f32 %v644_v55, %v180_v56  ;;  %v723_v58 = vpop.f32.mrb[1].mxu0 }
 0x12a   :  { %v184_v59 = vmax.f32 %v181_v57, 0.0 }
 0x12b   :  { %v277_v60 = vpop.f32.mrb[2].mxu0 }
 0x12c   :  { %762 = vmatmul.mubr.f32.vlgmr.msra.gmra.mrb[0].mxu1 %v184_v59  ;;  %v728_v61 = vpop.f32.mrb[3].mxu0 }
 0x12d   :  { %836 = vmatprep.mubr.msk.f32.mxu1 %vm1052_vm0, %v1053_v1  ;;  %895 = vmatpush3.bf16.msra.mxu1 %v894_v11  ;;  %v897_v1 = vpack.c.bf16 %v536_v12, %v535_v10 }
 0x12e   :  { %896 = vmatprep.subr.bf16.mxu1 %v1051_v0 }
 0x12f   :  { %v425_v3 = vpop.f32.mrb[4].mxu0 }
 0x130   :  { %v768_v4 = vpop.f32.mrb[5].mxu0 }
 0x131   :  { %898 = vmatpush3.bf16.msra.mxu1 %v897_v1 }
 0x132   :  { %899 = vmatprep.subr.bf16.mxu1 %v1051_v0 }
 0x135   :  { %901 = vmatpush3.bf16.msra.mxu1 %v900_v15 }
 0x136   :  { %902 = vmatprep.subr.bf16.mxu1 %v1051_v0 }
 0x139   :  { %904 = vmatpush3.bf16.msra.mxu1 %v903_v18 }
 0x13a   :  { %905 = vmatprep.subr.bf16.mxu1 %v1051_v0 }
 0x13d   :  { %907 = vmatpush3.bf16.msra.mxu1 %v906_v21 }
 0x13e   :  { %908 = vmatprep.subr.bf16.mxu1 %v1051_v0 }
 0x141   :  { %910 = vmatpush3.bf16.msra.mxu1 %v909_v24 }
 0x142   :  { %911 = vmatprep.subr.bf16.mxu1 %v1051_v0 }
 0x145   :  { %913 = vmatpush3.bf16.msra.mxu1 %v912_v27 }
 0x146   :  { %914 = vmatprep.subr.bf16.mxu1 %v1051_v0 }
 0x149   :  { %916 = vmatpush3.bf16.msra.mxu1 %v915_v37 }
 0x1ff   :  { %v347_v28 = vpop.f32.mrb[0].mxu1 }
 0x200   :  { %v348_v29 = vadd.f32 %v347_v28, %v277_v60  ;;  %v763_v30 = vpop.f32.mrb[1].mxu1 }
 0x202   :  { %v429_v32 = vadd.f32 %v425_v3, %v348_v29 }
 0x204   :  { %v437_v33 = vadd.f32 %v650_v31, %v429_v32 }
 0x206   :  { %v438_v34 = vmax.f32 %v437_v33, 0.0 }
 0x208   :  { %802 = vmatmul.mubr.f32.vlgmr.msra.gmra.mrb[6].mxu0 %v438_v34 }
 0x2db   :  { %v528_v0 = vpop.f32.mrb[6].mxu0 }
 0x2dc   :  { %v529_v39 = vadd.f32 %v651_v38, %v528_v0  ;;  %v803_v40 = vpop.f32.mrb[7].mxu0 }
 0x2de   :  { %v532_v41 = vmax.f32 %v529_v39, 0.0 }
 0x2e0   :  { %837 = vmatmul.mubr.f32.vlgmr.msra.gmra.mrb[2].mxu1 %v532_v41 }
 0x3b3   :  { %v622_v43 = vpop.f32.mrb[2].mxu1 }
 0x3b4   :  { %v623_v44 = vadd.f32 %v652_v42, %v622_v43  ;;  %v838_v45 = vpop.f32.mrb[3].mxu1 }
 0x3b6   :  { %626 = vst [vmem:[#allocation10] sm:$0xff] %v623_v44 }
 0x3b7   :  { %1026 = shalt.err (!%p1023_p8)
}
 0x3b8   :  { %s1027_s11 = scalar_lea.hbm %s1285_s13, 128 }
 0x3b9   :  { %p1028_p9 = scmp.ne.s32.totalorder %s1285_s13, %s1027_s11  ;;  %p1031_p10 = scmp.lt.u32.totalorder %s1027_s11, %s1285_s13 }
 0x3bb   :  { %p1033_p11 = pnand %p1031_p10, %p1028_p9 }
 0x3bd   :  { %1036 = shalt.err (!%p1033_p11)
}
 0x3be   :  { %636 = dma.vmem_to_hbm [thread:$0]  %s634_s24, 128, %s1285_s13, [#allocation4]  }
 0x3bf   :  { %1043 = dma.done.wait [#allocation4], 128  }
 0x3c0   :  { %1044 = vsyncadd [#allocation4], 4294967168 }
 0x3c1   :  { %640 = vsyncpa [#allocation3], 1 }
 0x3c2   :  { %641 = vsyncpa [#allocation6], 1 }
 0x3c3   :  { %642 = vsyncpa [#allocation9], 1 }
 0x3c4   :  { %643 = vsyncpa [#allocation4], 1 }

</bundles_post_ra>
